<compile_context>
chip_gen: v6e
topology: v6e:2x2x1
jax: 0.10.0
libtpu: 0.0.40
codegen_flags: <defaults>
</compile_context>

<pallas_src>
import numpy as np
import jax
import jax.numpy as jnp
from jax.experimental import pallas as pl
from jax.experimental.pallas import tpu as pltpu


def _round_up(n, m):
    return ((n + m - 1) // m) * m


def _cdiv(a, b):
    return (a + b - 1) // b


# ---------------------------------------------------------------------------
# Kernel: one MXU push per (batch tile, output tile, band K-tile) step.
# ---------------------------------------------------------------------------
def _sparse_linear_kernel(kbase_ref, x_ref, w_ref, b_ref, o_ref):
    del kbase_ref  # consumed by the index_maps only
    k = pl.program_id(2)

    @pl.when(k == 0)
    def _():
        o_ref[...] = jnp.zeros_like(o_ref)

    # Pre-masked banded weight: x only needs a dtype cast before the MXU.
    o_ref[...] += jnp.dot(x_ref[...].astype(w_ref.dtype), w_ref[...],
                          preferred_element_type=jnp.float32)

    @pl.when(k == pl.num_programs(2) - 1)
    def _():
        o_ref[...] += b_ref[...]


# ---------------------------------------------------------------------------
# One-time parameter packing (analogue of the PyTorch module's __init__)
# ---------------------------------------------------------------------------
def pack_params(w, mask, bias, gene_size, *, tn=128, tk=None,
                compute_dtype=jnp.bfloat16):
    """Pack (w, mask, bias) into the banded form the kernel consumes.

    Done once, outside the forward hot path.  Use tn=256 on v6e/v7x when
    D_out is large; compute_dtype=jnp.float32 keeps a full-f32 MXU path
    (recommended on v5e or when tighter accuracy is required).
    """
    w = jnp.asarray(w)
    mask = jnp.asarray(mask)
    bias = jnp.asarray(bias)
    D_in, D_out = w.shape
    gene_size = [int(g) for g in gene_size]
    assert D_in == sum(gene_size) and D_out == len(gene_size)

    # The packing is only valid for the contiguous block-diagonal mask the
    # module builds; verify instead of silently producing garbage.
    off = np.concatenate([[0], np.cumsum(np.asarray(gene_size, np.int64))])
    expected = np.zeros((D_in, D_out), np.float32)
    for i in range(D_out):
        expected[off[i]:off[i + 1], i] = 1.0
    assert np.array_equal(np.asarray(mask, np.float32), expected), \
        "mask is not the block-diagonal mask implied by gene_size"

    # K tile: split D_in into near-equal 128-multiples capped at 1024 so the
    # tiles are big but x is barely padded.
    if tk is None:
        n_k = max(1, _cdiv(D_in, 1024))
        tk = _round_up(_cdiv(D_in, n_k), 128)
    D_in_p = _round_up(D_in, tk)
    n_k_tiles = D_in_p // tk

    D_out_p = _round_up(D_out, tn)          # lane-dense output tiles
    num_j = D_out_p // tn

    # Per-output-tile K band: K tiles whose rows intersect the tile's genes.
    lo, hi = off[:-1], off[1:]
    kbase = np.zeros((num_j,), np.int32)
    need = np.zeros((num_j,), np.int64)
    for j in range(num_j):
        c0 = j * tn
        c1 = min((j + 1) * tn, D_out)
        first_row = int(lo[c0])
        last_row = int(hi[c1 - 1])
        kbase[j] = first_row // tk
        need[j] = _cdiv(last_row, tk) - kbase[j]
    kb = int(max(1, need.max()))
    kbase = np.minimum(kbase, n_k_tiles - kb).astype(np.int32)

    # Banded, pre-masked weight: rows [kbase[j]*tk, kbase[j]*tk + kb*tk) of
    # (w*mask) for the tn columns of tile j (zeros elsewhere / in padding).
    wm = np.zeros((D_in_p, D_out_p), np.float32)
    wm[:D_in, :D_out] = np.asarray(w * mask, np.float32)
    w_band = np.zeros((num_j, kb * tk, tn), np.float32)
    for j in range(num_j):
        r0 = int(kbase[j]) * tk
        w_band[j] = wm[r0:r0 + kb * tk, j * tn:(j + 1) * tn]
    w_band = jnp.asarray(w_band.reshape(num_j * kb * tk, tn), dtype=compute_dtype)

    bias_p = jnp.pad(jnp.asarray(bias, jnp.float32),
                     (0, D_out_p - D_out)).reshape(1, D_out_p)

    return dict(w_band=w_band, bias=bias_p, kbase=jnp.asarray(kbase),
                d_in=D_in, d_out=D_out, d_in_p=D_in_p, d_out_p=D_out_p,
                tk=tk, tn=tn, kb=kb, num_j=num_j)


# ---------------------------------------------------------------------------
# Forward wrapper
# ---------------------------------------------------------------------------
def sparse_linear(x, packed, *, tb=None):
    """out = x @ (w*mask) + bias, exploiting the block-diagonal mask."""
    B, D_in = x.shape
    assert D_in == packed["d_in"]
    D_in_p, D_out_p = packed["d_in_p"], packed["d_out_p"]
    tk, tn, kb, num_j = packed["tk"], packed["tn"], packed["kb"], packed["num_j"]

    if tb is None:
        tb = min(512, _round_up(B, 8))
        # v7x dual-TC: keep >=2 blocks on the "parallel" axes when possible.
        if num_j * (_round_up(B, tb) // tb) < 2 and tb > 8:
            tb = _round_up(_cdiv(B, 2), 8)
    B_p = _round_up(B, tb)

    if (B_p, D_in_p) != (B, D_in):
        # TODO(synk): for very large B/D_in fuse a bf16 downcast into this pad
        # pass (or pick tb/tk dividing B/D_in) so x is not re-streamed in HBM.
        x = jnp.pad(x, ((0, B_p - B), (0, D_in_p - D_in)))

    # VMEM budget from the actual tile footprint (double-buffered), <=64 MiB.
    w_itemsize = packed["w_band"].dtype.itemsize
    est = 2 * (tb * tk * 4 + tk * tn * w_itemsize + tb * tn * 4 + tn * 4)
    vmem_limit = int(min(max(2 * est, 32 << 20), 64 << 20))

    grid = (B_p // tb, num_j, kb)

    out = pl.pallas_call(
        _sparse_linear_kernel,
        out_shape=jax.ShapeDtypeStruct((B_p, D_out_p), jnp.float32),
        grid_spec=pltpu.PrefetchScalarGridSpec(
            num_scalar_prefetch=1,
            grid=grid,
            in_specs=[
                # x: only the K band of output tile j (skips dead K tiles).
                pl.BlockSpec((tb, tk),
                             lambda i, j, k, kbase: (i, kbase[j] + k)),
                # banded, pre-masked weight, keyed on (j, k).
                pl.BlockSpec((tk, tn),
                             lambda i, j, k, kbase, kb=kb: (j * kb + k, 0)),
                # bias
                pl.BlockSpec((1, tn), lambda i, j, k, kbase: (0, j)),
            ],
            out_specs=pl.BlockSpec((tb, tn), lambda i, j, k, kbase: (i, j)),
        ),
        compiler_params=pltpu.CompilerParams(
            dimension_semantics=("parallel", "parallel", "arbitrary"),
            vmem_limit_bytes=vmem_limit),
    )(packed["kbase"], x, packed["w_band"], packed["bias"])

    return out[:B, :packed["d_out"]]


# ---------------------------------------------------------------------------
# Module-faithful parameter init (matches the PyTorch __init__)
# ---------------------------------------------------------------------------
def build_mask(gene_size):
    input_dim = sum(gene_size)
    output_dim = len(gene_size)
    mask = np.zeros((input_dim, output_dim), dtype=np.float32)
    off = 0
    for i, g in enumerate(gene_size):
        mask[off:off + g, i] = 1.0
        off += g
    return jnp.asarray(mask)


def init_params(gene_size, key):
    input_dim = sum(gene_size)
    output_dim = len(gene_size)
    mask = build_mask(gene_size)
    scale = 1.0 * np.sqrt(6.0 / (input_dim + output_dim))
    kw, kb = jax.random.split(key)
    w = jax.random.uniform(kw, (input_dim, output_dim), jnp.float32,
                           minval=-scale, maxval=scale) * mask
    bias = jax.random.uniform(kb, (output_dim,), jnp.float32,
                              minval=-scale, maxval=scale)
    return w, mask, bias


if __name__ == "__main__":
    key = jax.random.PRNGKey(0)

    # Config 1: 4 uniform genes.  Config 2: non-uniform genes, ragged batch.
    # Config 3: many genes -> multiple output tiles and K tiles, exercising the
    #           scalar-prefetch K-band skipping (different kbase per output tile).
    configs = [
        ([8, 8, 8, 8], 8, {}),
        ([5, 11, 3, 13, 8], 10, {}),
        ([3, 5, 7, 9] * 50, 24, dict(tk=128)),
    ]

    for gene_size, B, pack_kwargs in configs:
        key, k_params, k_x = jax.random.split(key, 3)
        w, mask, bias = init_params(gene_size, k_params)
        x = jax.random.normal(k_x, (B, sum(gene_size)), jnp.float32)

        packed = pack_params(w, mask, bias, gene_size, **pack_kwargs)
        out = jax.block_until_ready(sparse_linear(x, packed))

        # Reference: exact PyTorch forward semantics in plain JAX (f32).
        ref = x @ (w * mask) + bias
        # bf16 MXU operands with f32 accumulation -> loose-but-safe tolerance.
        np.testing.assert_allclose(np.asarray(out), np.asarray(ref),
                                   rtol=2e-2, atol=2e-2)

    print("KERNEL_OK")
</pallas_src>

<mosaic_0001>
module attributes {stable_mosaic.version = 11 : i64} {
  func.func @_sparse_linear_kernel(%arg0: i32, %arg1: i32, %arg2: i32, %arg3: memref<1xi32, #tpu.memory_space<smem>>, %arg4: memref<8x128xf32, #tpu.memory_space<vmem>>, %arg5: memref<128x128xbf16, #tpu.memory_space<vmem>>, %arg6: memref<1x128xf32, #tpu.memory_space<vmem>>, %arg7: memref<8x128xf32, #tpu.memory_space<vmem>>) attributes {dimension_semantics = [#tpu.dimension_semantics<parallel>, #tpu.dimension_semantics<parallel>, #tpu.dimension_semantics<arbitrary>], iteration_bounds = array<i64: 1, 1, 1>, scalar_prefetch = 1 : i64, scratch_operands = 0 : i64, tpu.core_type = #tpu.core_type<tc>, window_params = [{transform_indices = @transform_0, window_bounds = array<i64: 8, 128>}, {transform_indices = @transform_1, window_bounds = array<i64: 128, 128>}, {transform_indices = @transform_2, window_bounds = array<i64: 1, 128>}, {transform_indices = @transform_3, window_bounds = array<i64: 8, 128>}]} {
    %c0_i32 = arith.constant 0 : i32
    %0 = arith.cmpi eq, %arg2, %c0_i32 : i32
    %1 = arith.extui %0 : i1 to i32
    %c0_i32_0 = arith.constant 0 : i32
    %2 = arith.cmpi ne, %1, %c0_i32_0 : i32
    scf.if %2 {
      %cst_10 = arith.constant 0.000000e+00 : f32
      %13 = vector.broadcast %cst_10 : f32 to vector<8x128xf32>
      %c0_11 = arith.constant 0 : index
      %c0_12 = arith.constant 0 : index
      %14 = vector.load %arg7[%c0_11, %c0_12] : memref<8x128xf32, #tpu.memory_space<vmem>>, vector<8x128xf32>
      tpu.vector_store %arg7[%c0_11, %c0_12], %13 {strides = array<i32>} : memref<8x128xf32, #tpu.memory_space<vmem>>, vector<8x128xf32>,
    } else {
    }
    %c0 = arith.constant 0 : index
    %c0_1 = arith.constant 0 : index
    %3 = vector.load %arg7[%c0, %c0_1] : memref<8x128xf32, #tpu.memory_space<vmem>>, vector<8x128xf32>
    %c0_2 = arith.constant 0 : index
    %c0_3 = arith.constant 0 : index
    %4 = vector.load %arg4[%c0_2, %c0_3] : memref<8x128xf32, #tpu.memory_space<vmem>>, vector<8x128xf32>
    %5 = arith.truncf %4 : vector<8x128xf32> to vector<8x128xbf16>
    %c0_4 = arith.constant 0 : index
    %c0_5 = arith.constant 0 : index
    %6 = vector.load %arg5[%c0_4, %c0_5] : memref<128x128xbf16, #tpu.memory_space<vmem>>, vector<128x128xbf16>
    %cst = arith.constant dense<0.000000e+00> : vector<8x128xf32>
    %7 = tpu.matmul %5, %6, %cst {dimension_numbers = #tpu.dot_dimension_numbers<[1], [0], [0], [1], [0, 0, 1, 1], [], []>} : vector<8x128xbf16>, vector<128x128xbf16>, vector<8x128xf32> -> vector<8x128xf32>
    %8 = arith.addf %3, %7 : vector<8x128xf32>
    %c0_6 = arith.constant 0 : index
    %c0_7 = arith.constant 0 : index
    %9 = vector.load %arg7[%c0_6, %c0_7] : memref<8x128xf32, #tpu.memory_space<vmem>>, vector<8x128xf32>
    tpu.vector_store %arg7[%c0_6, %c0_7], %8 {strides = array<i32>} : memref<8x128xf32, #tpu.memory_space<vmem>>, vector<8x128xf32>,
    %c0_i32_8 = arith.constant 0 : i32
    %10 = arith.cmpi eq, %arg2, %c0_i32_8 : i32
    %11 = arith.extui %10 : i1 to i32
    %c0_i32_9 = arith.constant 0 : i32
    %12 = arith.cmpi ne, %11, %c0_i32_9 : i32
    scf.if %12 {
      %c0_10 = arith.constant 0 : index
      %c0_11 = arith.constant 0 : index
      %13 = vector.load %arg7[%c0_10, %c0_11] : memref<8x128xf32, #tpu.memory_space<vmem>>, vector<8x128xf32>
      %c0_12 = arith.constant 0 : index
      %c0_13 = arith.constant 0 : index
      %14 = vector.load %arg6[%c0_12, %c0_13] : memref<1x128xf32, #tpu.memory_space<vmem>>, vector<1x128xf32>
      %15 = vector.broadcast %14 : vector<1x128xf32> to vector<8x128xf32>
      %16 = arith.addf %13, %15 : vector<8x128xf32>
      %c0_14 = arith.constant 0 : index
      %c0_15 = arith.constant 0 : index
      %17 = vector.load %arg7[%c0_14, %c0_15] : memref<8x128xf32, #tpu.memory_space<vmem>>, vector<8x128xf32>
      tpu.vector_store %arg7[%c0_14, %c0_15], %16 {strides = array<i32>} : memref<8x128xf32, #tpu.memory_space<vmem>>, vector<8x128xf32>,
    } else {
    }
    return
  }
  func.func @transform_0(%arg0: i32, %arg1: i32, %arg2: i32, %arg3: memref<1xi32, #tpu.memory_space<smem>>) -> (i32, i32) {
    %0 = arith.index_cast %arg1 : i32 to index
    %1 = memref.load %arg3[%0] : memref<1xi32, #tpu.memory_space<smem>>
    %2 = arith.addi %1, %arg2 : i32
    %c0_i32 = arith.constant 0 : i32
    return %arg0, %2 : i32, i32
  }
  func.func @transform_1(%arg0: i32, %arg1: i32, %arg2: i32, %arg3: memref<1xi32, #tpu.memory_space<smem>>) -> (i32, i32) {
    %c1_i32 = arith.constant 1 : i32
    %0 = arith.muli %arg1, %c1_i32 : i32
    %1 = arith.addi %0, %arg2 : i32
    %c0_i32 = arith.constant 0 : i32
    %c0_i32_0 = arith.constant 0 : i32
    return %1, %c0_i32 : i32, i32
  }
  func.func @transform_2(%arg0: i32, %arg1: i32, %arg2: i32, %arg3: memref<1xi32, #tpu.memory_space<smem>>) -> (i32, i32) {
    %c0_i32 = arith.constant 0 : i32
    %c0_i32_0 = arith.constant 0 : i32
    return %c0_i32, %arg1 : i32, i32
  }
  func.func @transform_3(%arg0: i32, %arg1: i32, %arg2: i32, %arg3: memref<1xi32, #tpu.memory_space<smem>>) -> (i32, i32) {
    %c0_i32 = arith.constant 0 : i32
    return %arg0, %arg1 : i32, i32
  }
}

</mosaic_0001>

<bundles_post_ra>
// kernel: tpu_custom_call.1
= control target key start
LH: loop header
LB: loop body
LE: loop exit
PB: predicated region body
PF: predicated region fallthrough
CT: control target
= control target key end

     0   :  { %10 = vsyncpa [#allocation5], 0  ;;  %s376_s0 = inlined_call_operand.<no memory space> [shape: s32[1], index: 0, kind: input, shape index: {}]   ;;  %s377_s1 = inlined_call_operand.hbm [shape: f32[8,128], index: 1, kind: input, shape index: {}]   ;;  %s378_s2 = inlined_call_operand.hbm [shape: bf16[128,128], index: 2, kind: input, shape index: {}]   ;;  %s379_s3 = inlined_call_operand.vmem [shape: f32[1,128], index: 3, kind: input, shape index: {}]   ;;  %s380_s4 = inlined_call_operand.hbm [shape: f32[8,128], index: 4, kind: output, shape index: {}]  }
   0x1   :  { %11 = vsyncpa [#allocation8], 0 }
   0x2   :  { %12 = vsyncpa [#allocation6], 0  ;;  %s201_s17 = sshll.u32 %s376_s0, 7  ;;  %s323_s21 = smov [#allocation4]  }
   0x3   :  { %s21_s20 = scalar_lea.hbm %s377_s1, %s201_s17  ;;  %s23_s22 = sshll.u32 %s323_s21, 4  ;;  %s24_s22 = int_to_ptr.vmem [resolvable:$true] %s23_s22 }
   0x4   :  { %s255_s23 = scalar_lea.hbm %s21_s20, 128  ;;  %s257_s26 = scalar_lea.hbm %s377_s1, 128 }
   0x5   :  { %p256_p0 = scmp.ne.s32.totalorder %s21_s20, %s255_s23  ;;  %p258_p1 = scmp.lt.s32.totalorder %s21_s20, %s377_s1 }
   0x6   :  { %p259_p2 = scmp.lt.s32.totalorder %s257_s26, %s255_s23 }
   0x8   :  { %p260_p3 = por %p259_p2, %p258_p1 }
   0xa   :  { %p261_p4 = pnand %p260_p3, %p256_p0 }
   0xc   :  { %264 = shalt.err (!%p261_p4)
}
   0xd   :  { %s265_s0 = scalar_lea.vmem %s24_s22, 128  ;;  %p270_p6 = scmp.lt.s32.totalorder %s24_s22, %s24_s22 }
   0xe   :  { %p266_p5 = scmp.ne.s32.totalorder %s24_s22, %s265_s0  ;;  %p271_p7 = scmp.lt.s32.totalorder %s265_s0, %s265_s0 }
  0x10   :  { %p272_p8 = por %p271_p7, %p270_p6 }
  0x12   :  { %p273_p9 = pnand %p272_p8, %p266_p5 }
  0x14   :  { %276 = shalt.err (!%p273_p9)
}
  0x15   :  { %26 = dma.hbm_to_vmem [thread:$0]  %s21_s20, 128, %s24_s22, [#allocation5]  }
  0x16   :  { %s324_s29 = smov [#allocation7]  }
  0x17   :  { %s36_s30 = sshll.u32 %s324_s29, 4  ;;  %s37_s30 = int_to_ptr.vmem [resolvable:$true] %s36_s30 }
  0x18   :  { %s285_s5 = scalar_lea.vmem %s37_s30, 1024  ;;  %p290_p11 = scmp.lt.s32.totalorder %s37_s30, %s37_s30 }
  0x19   :  { %p286_p10 = scmp.ne.s32.totalorder %s37_s30, %s285_s5  ;;  %p291_p12 = scmp.lt.s32.totalorder %s285_s5, %s285_s5 }
  0x1b   :  { %p292_p13 = por %p291_p12, %p290_p11 }
  0x1d   :  { %p293_p1 = pnand %p292_p13, %p286_p10 }
  0x1f   :  { %296 = shalt.err (!%p293_p1)
}
  0x20   :  { %s325_s1 = smov 64   ;;  %s326_s6 = smov 4  }
  0x21   :  { %42 = dma.hbm_to_vmem [thread:$0]  %s378_s2, 1024, %s37_s30, [#allocation8], %s325_s1, %s325_s1, %s326_s6  }
  0x22   :  { %317 = dma.done.wait [#allocation5], 128  }
  0x23   :  { %318 = vsyncadd [#allocation5], 4294967168 }
  0x24   :  { %319 = dma.done.wait [#allocation8], 1024  }
  0x25   :  { %320 = vsyncadd [#allocation8], 4294966272  ;;  %v327_v0 = vmov 0.0   ;;  %vm328_vm0 = vmmov 0   ;;  %v247_v1 = vld [vmem:[#allocation7 + $0x38] sm:$0xff]   ;;  %v248_v2 = vld [vmem:[#allocation7 + $0x30] sm:$0xff]  }
  0x26   :  { %220 = vmatprep.subr.bf16.mxu0 %v327_v0  ;;  %236 = vmatprep.mubr.msk.bf16.mxu0 %vm328_vm0, %v327_v0  ;;  %v249_v3 = vld [vmem:[#allocation7 + $0x28] sm:$0xff]   ;;  %v250_v4 = vld [vmem:[#allocation7 + $0x20] sm:$0xff]   ;;  %v251_v5 = vld [vmem:[#allocation7 + $0x18] sm:$0xff]   ;;  %s329_s10 = smov [#allocation9]  }
  0x27   :  { %221 = vmatpush3.bf16.msra.mxu0 %v247_v1  ;;  %v252_v6 = vld [vmem:[#allocation7 + $0x10] sm:$0xff]   ;;  %v253_v7 = vld [vmem:[#allocation7 + $0x8] sm:$0xff]   ;;  %v254_v8 = vld [vmem:[#allocation7] sm:$0xff]   ;;  %s189_s11 = sshll.u32 %s329_s10, 4  ;;  %s190_s11 = int_to_ptr.vmem [resolvable:$true] %s189_s11 }
  0x28   :  { %222 = vmatprep.subr.bf16.mxu0 %v327_v0  ;;  %v62_v9 = vld [vmem:[#allocation4] sm:$0xff]  ;;  %s297_s12 = scalar_lea.vmem %s190_s11, 128  ;;  %p302_p2 = scmp.lt.s32.totalorder %s190_s11, %s190_s11 }
  0x29   :  { %v63_v10 = vpack.c.bf16 %v62_v9, %v62_v9  ;;  %v210_v12 = vld [vmem:[%s379_s3] ss:$0 sm:$0xff]  ;;  %p298_p0 = scmp.ne.s32.totalorder %s190_s11, %s297_s12  ;;  %p303_p3 = scmp.lt.s32.totalorder %s297_s12, %s297_s12 }
  0x2b   :  { %223 = vmatpush3.bf16.msra.mxu0 %v248_v2  ;;  %p304_p4 = por %p303_p3, %p302_p2 }
  0x2c   :  { %224 = vmatprep.subr.bf16.mxu0 %v327_v0 }
  0x2d   :  { %p305_p5 = pnand %p304_p4, %p298_p0 }
  0x2f   :  { %225 = vmatpush3.bf16.msra.mxu0 %v249_v3 }
  0x30   :  { %226 = vmatprep.subr.bf16.mxu0 %v327_v0 }
  0x33   :  { %227 = vmatpush3.bf16.msra.mxu0 %v250_v4 }
  0x34   :  { %228 = vmatprep.subr.bf16.mxu0 %v327_v0 }
  0x37   :  { %229 = vmatpush3.bf16.msra.mxu0 %v251_v5 }
  0x38   :  { %230 = vmatprep.subr.bf16.mxu0 %v327_v0 }
  0x3b   :  { %231 = vmatpush3.bf16.msra.mxu0 %v252_v6 }
  0x3c   :  { %232 = vmatprep.subr.bf16.mxu0 %v327_v0 }
  0x3f   :  { %233 = vmatpush3.bf16.msra.mxu0 %v253_v7 }
  0x40   :  { %234 = vmatprep.subr.bf16.mxu0 %v327_v0 }
  0x43   :  { %235 = vmatpush3.bf16.msra.mxu0 %v254_v8 }
  0x46   :  { %237 = vmatmul.mubr.bf16.vlgmr.msra.gmra.mxu0 %v63_v10 }
 0x106   :  { %v162_v11 = vpop.f32.mrf.mxu0 }
 0x107   :  { %v181_v14 = vadd.f32 %v210_v12, %v162_v11 }
 0x108   :  { %v238_v13 = vpop.f32.mrf.mxu0 }
 0x109   :  { %182 = vst [vmem:[#allocation9] sm:$0xff] %v181_v14 }
 0x10a   :  { %v165_v15 = vpop.f32.mrf.mxu0 }
 0x10c   :  { %v239_v16 = vpop.f32.mrf.mxu0 }
 0x10d   :  { %308 = shalt.err (!%p305_p5)
}
 0x10e   :  { %192 = dma.vmem_to_hbm [thread:$0]  %s190_s11, 128, %s380_s4, [#allocation6]  }
 0x10f   :  { %321 = dma.done.wait [#allocation6], 128  }
 0x110   :  { %322 = vsyncadd [#allocation6], 4294967168 }
 0x111   :  { %196 = vsyncpa [#allocation5], 1 }
 0x112   :  { %197 = vsyncpa [#allocation8], 1 }
 0x113   :  { %198 = vsyncpa [#allocation6], 1 }

</bundles_post_ra>
